<compile_context>
chip_gen: v5e
topology: v5e:2x2
jax: 0.10.0
libtpu: 0.0.40
codegen_flags: <defaults>
</compile_context>

<pallas_src>
import jax
import jax.numpy as jnp
from jax.experimental import pallas as pl
from jax.experimental.pallas import tpu as pltpu


NUM_HEADS = 11   # auditory, gustatory, haptic, interoceptive, olfactory, visual,
                 # foot_leg, hand_arm, head, mouth, torso
HEAD_PAD = 128   # heads zero-padded to a full lane width -> unmasked vst stores


# --------------------------------------------------------------------------- #
# small helpers
# --------------------------------------------------------------------------- #
def _round_up(x, m):
    return ((x + m - 1) // m) * m


def _batch_tiling(batch, block_b):
    """Batch tile size (multiple of 16 rows for bf16 sublane packing)."""
    block_b = max(16, _round_up(block_b, 16))
    b16 = _round_up(batch, 16)
    tb = min(block_b, b16)
    # v7x: keep >= 2 grid steps on the "parallel" batch axis (two TensorCores)
    # once the batch is big enough, while keeping tiles >= 256 rows so the
    # 256-wide MXU M dimension stays filled on v6e/v7x.
    if b16 >= 512:
        tb = min(tb, max(256, _round_up(b16 // 2, 16)))
    b_pad = _round_up(batch, tb)
    return tb, b_pad, b_pad // tb


def _seq_tiling(seq, tile_b, hidden, block_s=256, target_bytes=4 << 20):
    """Sequence tile size: keep the [tb, ts, H] bf16 tile around target_bytes."""
    s16 = _round_up(seq, 16)
    ts_cap = max(16, (target_bytes // max(1, tile_b * hidden * 2)) // 16 * 16)
    ts = min(_round_up(block_s, 16), s16, ts_cap)
    s_pad = _round_up(s16, ts)
    return ts, s_pad, s_pad // ts


def _vmem_limit(estimate_bytes):
    # explicit scoped-VMEM limit: enough headroom for the tiles, capped at the
    # v7x physical budget (64 MiB / TensorCore).
    return int(min(64 << 20, max(24 << 20, int(estimate_bytes * 1.5))))


# --------------------------------------------------------------------------- #
# kernels
# --------------------------------------------------------------------------- #
def _heads_kernel(x_ref, wp_ref, bp_ref, wh_ref, bh_ref, out_ref):
    """Stand-in pooler dense (tanh) + the 11 fused Linear(H, 1) heads.

    x_ref:  [TB, H]    pooled features (bf16)
    wp_ref: [H, H]     pooler dense weight, [in, out] layout (bf16)
    bp_ref: [1, H]     pooler dense bias (f32)
    wh_ref: [H, 128]   stacked head weights, zero-padded past column 10 (bf16)
    bh_ref: [1, 128]   stacked head biases, zero-padded (f32)
    out_ref:[TB, 128]  head outputs (columns 0..10 are the real heads, f32)
    """
    h = jnp.dot(x_ref[...], wp_ref[...], preferred_element_type=jnp.float32)
    pooled = jnp.tanh(h + bp_ref[...]).astype(jnp.bfloat16)
    out_ref[...] = (
        jnp.dot(pooled, wh_ref[...], preferred_element_type=jnp.float32)
        + bh_ref[...])


def _fused_pool_heads_kernel(emb_ref, invn_ref, wp_ref, bp_ref, wh_ref, bh_ref,
                             out_ref, sum_sc):
    """Fused masked mean-pool (over the seq grid axis) + pooler + 11 heads.

    grid = (batch tiles ["parallel"], seq tiles ["arbitrary"])
    emb_ref : [TB, TS, H]  embedding tile (bf16); masked/padded tokens already
                           point at the all-zero embedding row.
    invn_ref: [TB, 1]      1 / max(valid-token count, 1)  (f32)
    sum_sc  : [TB, H]      VMEM accumulator (f32), persists across seq steps.
    """
    j = pl.program_id(1)

    @pl.when(j == 0)
    def _init():
        sum_sc[...] = jnp.zeros_like(sum_sc)

    # Masked tokens are the zero row, so a plain sum over the tile == masked sum.
    sum_sc[...] += jnp.sum(emb_ref[...].astype(jnp.float32), axis=1)

    @pl.when(j == pl.num_programs(1) - 1)
    def _finalize():
        x = (sum_sc[...] * invn_ref[...]).astype(jnp.bfloat16)      # mean pool
        h = jnp.dot(x, wp_ref[...], preferred_element_type=jnp.float32)
        pooled = jnp.tanh(h + bp_ref[...]).astype(jnp.bfloat16)
        out_ref[...] = (
            jnp.dot(pooled, wh_ref[...], preferred_element_type=jnp.float32)
            + bh_ref[...])


# --------------------------------------------------------------------------- #
# wrappers
# --------------------------------------------------------------------------- #
def sensorimotor_heads(x, prep, *, block_b=512):
    """Pooler dense (stand-in) + 11 fused heads.  x: [B, H] float.  -> [B, 11]."""
    B, H = x.shape
    tb, b_pad, grid_b = _batch_tiling(B, block_b)

    x_p = x.astype(jnp.bfloat16)                       # cast before padding
    if b_pad != B:
        x_p = jnp.zeros((b_pad, H), jnp.bfloat16).at[:B, :].set(x_p)

    est = (2 * tb * H * 2                               # x tiles (double-buffered)
           + H * H * 2 + H * HEAD_PAD * 2 + (H + HEAD_PAD) * 4   # weights
           + 2 * tb * HEAD_PAD * 4)                     # out tiles

    def build(single_buffer_weights):
        def w_spec(shape):
            if single_buffer_weights:
                return pl.BlockSpec(shape, lambda i: (0, 0),
                                    pipeline_mode=pl.Buffered(1))
            return pl.BlockSpec(shape, lambda i: (0, 0))

        return pl.pallas_call(
            _heads_kernel,
            out_shape=jax.ShapeDtypeStruct((b_pad, HEAD_PAD), jnp.float32),
            grid_spec=pltpu.PrefetchScalarGridSpec(
                num_scalar_prefetch=0,
                grid=(grid_b,),
                in_specs=[
                    pl.BlockSpec((tb, H), lambda i: (i, 0)),   # batch-tiled x
                    w_spec((H, H)),                            # grid-invariant
                    w_spec((1, H)),
                    w_spec((H, HEAD_PAD)),
                    w_spec((1, HEAD_PAD)),
                ],
                out_specs=pl.BlockSpec((tb, HEAD_PAD), lambda i: (i, 0)),
            ),
            compiler_params=pltpu.CompilerParams(
                dimension_semantics=("parallel",),
                vmem_limit_bytes=_vmem_limit(est),
            ),
        )

    args = (x_p, prep["w_pool"], prep["b_pool"], prep["w_heads"], prep["b_heads"])
    try:
        out = build(True)(*args)
    except Exception:        # Buffered(1) rejected -> default double-buffering
        out = build(False)(*args)
    return out[:B, :NUM_HEADS]


def sensorimotor_fused(prep, input_ids, attention_mask, *,
                       block_b=256, block_s=256):
    """Fused embed masked-mean-pool + pooler + 11 heads.  -> [B, 11] f32."""
    B, S = input_ids.shape
    H = prep["w_pool"].shape[0]
    zero_row = prep["embedding"].shape[0] - 1          # appended all-zero row

    tb, b_pad, grid_b = _batch_tiling(B, block_b)
    ts, s_pad, grid_s = _seq_tiling(S, tb, H, block_s=block_s)

    if attention_mask is None:
        attention_mask = jnp.ones((B, S), jnp.int32)

    # Pad ids / mask (cheap [B, S] integer work) so the gather directly emits the
    # padded [b_pad, s_pad, H] bf16 embedding stream; masked and padded tokens are
    # redirected to the zero embedding row, folding the mask into the gather.
    ids = jnp.zeros((b_pad, s_pad), input_ids.dtype).at[:B, :S].set(input_ids)
    msk = jnp.zeros((b_pad, s_pad), jnp.float32).at[:B, :S].set(
        attention_mask.astype(jnp.float32))
    ids = jnp.where(msk > 0.5, ids, zero_row)
    emb = jnp.take(prep["embedding"], ids, axis=0)        # [b_pad, s_pad, H] bf16
    inv_n = 1.0 / jnp.maximum(jnp.sum(msk, axis=1, keepdims=True), 1.0)  # [b_pad,1]

    est = (2 * tb * ts * H * 2                            # emb tiles (dbl-buffered)
           + H * H * 2 + H * HEAD_PAD * 2 + (H + HEAD_PAD) * 4
           + 2 * tb * 4                                   # inv_n tiles
           + 2 * tb * HEAD_PAD * 4                        # out tiles
           + tb * H * 4)                                  # sum scratch

    def build(single_buffer_weights):
        def w_spec(shape):
            if single_buffer_weights:
                return pl.BlockSpec(shape, lambda i, j: (0, 0),
                                    pipeline_mode=pl.Buffered(1))
            return pl.BlockSpec(shape, lambda i, j: (0, 0))

        return pl.pallas_call(
            _fused_pool_heads_kernel,
            out_shape=jax.ShapeDtypeStruct((b_pad, HEAD_PAD), jnp.float32),
            grid_spec=pltpu.PrefetchScalarGridSpec(
                num_scalar_prefetch=0,
                grid=(grid_b, grid_s),
                in_specs=[
                    pl.BlockSpec((tb, ts, H), lambda i, j: (i, j, 0)),  # emb
                    pl.BlockSpec((tb, 1), lambda i, j: (i, 0)),         # 1/count
                    w_spec((H, H)),                                     # weights:
                    w_spec((1, H)),                                     # fetched
                    w_spec((H, HEAD_PAD)),                              # once,
                    w_spec((1, HEAD_PAD)),                              # resident
                ],
                out_specs=pl.BlockSpec((tb, HEAD_PAD), lambda i, j: (i, 0)),
                scratch_shapes=[pltpu.VMEM((tb, H), jnp.float32)],
            ),
            compiler_params=pltpu.CompilerParams(
                dimension_semantics=("parallel", "arbitrary"),
                vmem_limit_bytes=_vmem_limit(est),
            ),
        )

    args = (emb, inv_n, prep["w_pool"], prep["b_pool"],
            prep["w_heads"], prep["b_heads"])
    try:
        out = build(True)(*args)
    except Exception:        # Buffered(1) rejected -> default double-buffering
        out = build(False)(*args)
    return out[:B, :NUM_HEADS]


def sensorimotor_predictor_forward(prep, input_ids, attention_mask=None,
                                   token_type_ids=None, *, split_outputs=True):
    """Mirrors Sensorimotor_predictor.forward.

    split_outputs=True  -> tuple of 11 [B, 1] arrays (PyTorch module semantics).
    split_outputs=False -> single fused [B, 11] slab (preferred for throughput).
    """
    del token_type_ids  # unused by the stand-in backbone
    out = sensorimotor_fused(prep, input_ids, attention_mask)
    if not split_outputs:
        return out
    return tuple(out[:, k:k + 1] for k in range(NUM_HEADS))


# --------------------------------------------------------------------------- #
# parameters
# --------------------------------------------------------------------------- #
def init_params(key, vocab_size, hidden_size):
    ks = jax.random.split(key, 5)
    scale = 1.0 / jnp.sqrt(hidden_size)
    return {
        "embedding": jax.random.normal(ks[0], (vocab_size, hidden_size),
                                       jnp.float32) * 0.02,
        # stand-in pooler dense, stored [in, out] so the kernel does x @ Wp
        "w_pool": jax.random.uniform(ks[1], (hidden_size, hidden_size),
                                     jnp.float32, -scale, scale),
        "b_pool": jax.random.uniform(ks[2], (1, hidden_size), jnp.float32,
                                     -scale, scale),
        # 11 heads stacked as columns, [in, out] = [H, 11].
        # NOTE: real nn.Linear weights are [out, in] = [1, H] per head and must
        # be transposed / stacked into this layout when porting checkpoints.
        "w_heads": jax.random.uniform(ks[3], (hidden_size, NUM_HEADS),
                                      jnp.float32, -scale, scale),
        "b_heads": jax.random.uniform(ks[4], (1, NUM_HEADS), jnp.float32,
                                      -scale, scale),
    }


def prepare_kernel_params(params):
    """One-time (load-time) weight preprocessing for the kernels."""
    H = params["w_pool"].shape[0]
    wh = jnp.zeros((H, HEAD_PAD), jnp.bfloat16).at[:, :NUM_HEADS].set(
        params["w_heads"].astype(jnp.bfloat16))
    bh = jnp.zeros((1, HEAD_PAD), jnp.float32).at[:, :NUM_HEADS].set(
        params["b_heads"].astype(jnp.float32))
    emb = jnp.concatenate(
        [params["embedding"].astype(jnp.bfloat16),
         jnp.zeros((1, H), jnp.bfloat16)], axis=0)   # trailing all-zero row
    return {
        "embedding": emb,
        "w_pool": params["w_pool"].astype(jnp.bfloat16),
        "b_pool": params["b_pool"].astype(jnp.float32).reshape(1, H),
        "w_heads": wh,
        "b_heads": bh,
    }


# --------------------------------------------------------------------------- #
# test
# --------------------------------------------------------------------------- #
if __name__ == "__main__":
    key = jax.random.PRNGKey(0)
    k_param, k_ids, k_len = jax.random.split(key, 3)

    B, S, H, VOCAB = 8, 8, 128, 100   # small shapes consistent with the module
    params = init_params(k_param, VOCAB, H)
    prep = prepare_kernel_params(params)     # hoisted, one-time weight prep

    input_ids = jax.random.randint(k_ids, (B, S), 0, VOCAB, dtype=jnp.int32)
    lengths = jax.random.randint(k_len, (B,), 1, S + 1, dtype=jnp.int32)
    attention_mask = (jnp.arange(S)[None, :] < lengths[:, None]).astype(jnp.int32)

    # fused slab (preferred throughput interface)
    slab = sensorimotor_predictor_forward(prep, input_ids, attention_mask,
                                          split_outputs=False)
    slab = jax.block_until_ready(slab)
    assert slab.shape == (B, NUM_HEADS)

    # PyTorch-module semantics: 11 separate [B, 1] outputs
    outputs = sensorimotor_predictor_forward(prep, input_ids, attention_mask)
    outputs = jax.block_until_ready(outputs)
    assert len(outputs) == NUM_HEADS and all(o.shape == (B, 1) for o in outputs)
    got = jnp.concatenate(outputs, axis=1)
    assert jnp.allclose(got, slab, atol=1e-6, rtol=1e-6)

    # --- references ---
    m = attention_mask.astype(jnp.float32)[..., None]

    # (a) reference matching the kernel's bf16 input precision
    emb_bf = jnp.take(prep["embedding"].astype(jnp.float32), input_ids, axis=0)
    x_in = (jnp.sum(emb_bf * m, axis=1)
            * (1.0 / jnp.maximum(jnp.sum(m, axis=1), 1.0)))
    xb = x_in.astype(jnp.bfloat16).astype(jnp.float32)
    wpb = prep["w_pool"].astype(jnp.float32)
    pooled_bf = jnp.tanh(xb @ wpb + prep["b_pool"])
    pb = pooled_bf.astype(jnp.bfloat16).astype(jnp.float32)
    ref_bf = (pb @ prep["w_heads"].astype(jnp.float32)[:, :NUM_HEADS]
              + prep["b_heads"][:, :NUM_HEADS])
    assert jnp.allclose(slab, ref_bf, atol=3e-3, rtol=3e-3), \
        float(jnp.max(jnp.abs(slab - ref_bf)))

    # (b) loose check against the pure-f32 module math (bf16 rounding only)
    emb_f = jnp.take(params["embedding"], input_ids, axis=0)
    x_f = jnp.sum(emb_f * m, axis=1) / jnp.maximum(jnp.sum(m, axis=1), 1.0)
    pooled_f = jnp.tanh(x_f @ params["w_pool"] + params["b_pool"])
    ref_f = pooled_f @ params["w_heads"] + params["b_heads"]
    assert jnp.allclose(slab, ref_f, atol=3e-2, rtol=3e-2)

    # (c) heads-only kernel (the module's real hot path when an external encoder
    #     supplies pooler_output), including a ragged batch
    out_heads = sensorimotor_heads(x_in, prep)
    out_heads = jax.block_until_ready(out_heads)
    assert out_heads.shape == (B, NUM_HEADS)
    assert jnp.allclose(out_heads, slab, atol=3e-3, rtol=3e-3)

    out5 = sensorimotor_heads(x_in[:5], prep)
    out5 = jax.block_until_ready(out5)
    assert out5.shape == (5, NUM_HEADS)
    assert jnp.allclose(out5, out_heads[:5], atol=1e-5, rtol=1e-5)

    print("KERNEL_OK")
</pallas_src>

<mosaic_0001>
module attributes {stable_mosaic.version = 11 : i64} {
  func.func @_fused_pool_heads_kernel(%arg0: i32, %arg1: i32, %arg2: memref<16x16x128xbf16, #tpu.memory_space<vmem>>, %arg3: memref<16x1xf32, #tpu.memory_space<vmem>>, %arg4: memref<128x128xbf16, #tpu.memory_space<vmem>>, %arg5: memref<1x128xf32, #tpu.memory_space<vmem>>, %arg6: memref<128x128xbf16, #tpu.memory_space<vmem>>, %arg7: memref<1x128xf32, #tpu.memory_space<vmem>>, %arg8: memref<16x128xf32, #tpu.memory_space<vmem>>, %arg9: memref<16x128xf32, #tpu.memory_space<vmem>>) attributes {dimension_semantics = [#tpu.dimension_semantics<parallel>, #tpu.dimension_semantics<arbitrary>], iteration_bounds = array<i64: 1, 1>, scalar_prefetch = 0 : i64, scratch_operands = 1 : i64, tpu.core_type = #tpu.core_type<tc>, window_params = [{transform_indices = @transform_0, window_bounds = array<i64: 16, 16, 128>}, {transform_indices = @transform_1, window_bounds = array<i64: 16, 1>}, {pipeline_mode = #tpu.pipeline_mode<synchronous>, transform_indices = @transform_2, window_bounds = array<i64: 128, 128>}, {pipeline_mode = #tpu.pipeline_mode<synchronous>, transform_indices = @transform_3, window_bounds = array<i64: 1, 128>}, {pipeline_mode = #tpu.pipeline_mode<synchronous>, transform_indices = @transform_4, window_bounds = array<i64: 128, 128>}, {pipeline_mode = #tpu.pipeline_mode<synchronous>, transform_indices = @transform_5, window_bounds = array<i64: 1, 128>}, {transform_indices = @transform_6, window_bounds = array<i64: 16, 128>}]} {
    %c0_i32 = arith.constant 0 : i32
    %0 = arith.cmpi eq, %arg1, %c0_i32 : i32
    %1 = arith.extui %0 : i1 to i32
    %c0_i32_0 = arith.constant 0 : i32
    %2 = arith.cmpi ne, %1, %c0_i32_0 : i32
    scf.if %2 {
      %cst_9 = arith.constant 0.000000e+00 : f32
      %12 = vector.broadcast %cst_9 : f32 to vector<16x128xf32>
      %c0_10 = arith.constant 0 : index
      %c0_11 = arith.constant 0 : index
      %13 = vector.load %arg9[%c0_10, %c0_11] : memref<16x128xf32, #tpu.memory_space<vmem>>, vector<16x128xf32>
      tpu.vector_store %arg9[%c0_10, %c0_11], %12 {strides = array<i32>} : memref<16x128xf32, #tpu.memory_space<vmem>>, vector<16x128xf32>,
    } else {
    }
    %c0 = arith.constant 0 : index
    %c0_1 = arith.constant 0 : index
    %3 = vector.load %arg9[%c0, %c0_1] : memref<16x128xf32, #tpu.memory_space<vmem>>, vector<16x128xf32>
    %c0_2 = arith.constant 0 : index
    %c0_3 = arith.constant 0 : index
    %c0_4 = arith.constant 0 : index
    %4 = vector.load %arg2[%c0_2, %c0_3, %c0_4] : memref<16x16x128xbf16, #tpu.memory_space<vmem>>, vector<16x16x128xbf16>
    %5 = arith.extf %4 : vector<16x16x128xbf16> to vector<16x16x128xf32>
    %cst = arith.constant dense<0.000000e+00> : vector<16x128xf32>
    %6 = vector.multi_reduction <add>, %5, %cst [1] : vector<16x16x128xf32> to vector<16x128xf32>
    %7 = arith.addf %3, %6 : vector<16x128xf32>
    %c0_5 = arith.constant 0 : index
    %c0_6 = arith.constant 0 : index
    %8 = vector.load %arg9[%c0_5, %c0_6] : memref<16x128xf32, #tpu.memory_space<vmem>>, vector<16x128xf32>
    tpu.vector_store %arg9[%c0_5, %c0_6], %7 {strides = array<i32>} : memref<16x128xf32, #tpu.memory_space<vmem>>, vector<16x128xf32>,
    %c0_i32_7 = arith.constant 0 : i32
    %9 = arith.cmpi eq, %arg1, %c0_i32_7 : i32
    %10 = arith.extui %9 : i1 to i32
    %c0_i32_8 = arith.constant 0 : i32
    %11 = arith.cmpi ne, %10, %c0_i32_8 : i32
    scf.if %11 {
      %c0_9 = arith.constant 0 : index
      %c0_10 = arith.constant 0 : index
      %12 = vector.load %arg9[%c0_9, %c0_10] : memref<16x128xf32, #tpu.memory_space<vmem>>, vector<16x128xf32>
      %c0_11 = arith.constant 0 : index
      %c0_12 = arith.constant 0 : index
      %13 = vector.load %arg3[%c0_11, %c0_12] : memref<16x1xf32, #tpu.memory_space<vmem>>, vector<16x1xf32>
      %14 = vector.broadcast %13 : vector<16x1xf32> to vector<16x128xf32>
      %15 = arith.mulf %12, %14 : vector<16x128xf32>
      %16 = arith.truncf %15 : vector<16x128xf32> to vector<16x128xbf16>
      %c0_13 = arith.constant 0 : index
      %c0_14 = arith.constant 0 : index
      %17 = vector.load %arg4[%c0_13, %c0_14] : memref<128x128xbf16, #tpu.memory_space<vmem>>, vector<128x128xbf16>
      %cst_15 = arith.constant dense<0.000000e+00> : vector<16x128xf32>
      %18 = tpu.matmul %16, %17, %cst_15 {dimension_numbers = #tpu.dot_dimension_numbers<[1], [0], [0], [1], [0, 0, 1, 1], [], []>} : vector<16x128xbf16>, vector<128x128xbf16>, vector<16x128xf32> -> vector<16x128xf32>
      %c0_16 = arith.constant 0 : index
      %c0_17 = arith.constant 0 : index
      %19 = vector.load %arg5[%c0_16, %c0_17] : memref<1x128xf32, #tpu.memory_space<vmem>>, vector<1x128xf32>
      %20 = vector.broadcast %19 : vector<1x128xf32> to vector<16x128xf32>
      %21 = arith.addf %18, %20 : vector<16x128xf32>
      %22 = math.tanh %21 : vector<16x128xf32>
      %23 = arith.truncf %22 : vector<16x128xf32> to vector<16x128xbf16>
      %c0_18 = arith.constant 0 : index
      %c0_19 = arith.constant 0 : index
      %24 = vector.load %arg6[%c0_18, %c0_19] : memref<128x128xbf16, #tpu.memory_space<vmem>>, vector<128x128xbf16>
      %cst_20 = arith.constant dense<0.000000e+00> : vector<16x128xf32>
      %25 = tpu.matmul %23, %24, %cst_20 {dimension_numbers = #tpu.dot_dimension_numbers<[1], [0], [0], [1], [0, 0, 1, 1], [], []>} : vector<16x128xbf16>, vector<128x128xbf16>, vector<16x128xf32> -> vector<16x128xf32>
      %c0_21 = arith.constant 0 : index
      %c0_22 = arith.constant 0 : index
      %26 = vector.load %arg7[%c0_21, %c0_22] : memref<1x128xf32, #tpu.memory_space<vmem>>, vector<1x128xf32>
      %27 = vector.broadcast %26 : vector<1x128xf32> to vector<16x128xf32>
      %28 = arith.addf %25, %27 : vector<16x128xf32>
      %c0_23 = arith.constant 0 : index
      %c0_24 = arith.constant 0 : index
      %29 = vector.load %arg8[%c0_23, %c0_24] : memref<16x128xf32, #tpu.memory_space<vmem>>, vector<16x128xf32>
      tpu.vector_store %arg8[%c0_23, %c0_24], %28 {strides = array<i32>} : memref<16x128xf32, #tpu.memory_space<vmem>>, vector<16x128xf32>,
    } else {
    }
    return
  }
  func.func @transform_0(%arg0: i32, %arg1: i32) -> (i32, i32, i32) {
    %c0_i32 = arith.constant 0 : i32
    %c0_i32_0 = arith.constant 0 : i32
    return %arg0, %arg1, %c0_i32 : i32, i32, i32
  }
  func.func @transform_1(%arg0: i32, %arg1: i32) -> (i32, i32) {
    %c0_i32 = arith.constant 0 : i32
    %c0_i32_0 = arith.constant 0 : i32
    return %arg0, %c0_i32 : i32, i32
  }
  func.func @transform_2(%arg0: i32, %arg1: i32) -> (i32, i32) {
    %c0_i32 = arith.constant 0 : i32
    %c0_i32_0 = arith.constant 0 : i32
    %c0_i32_1 = arith.constant 0 : i32
    return %c0_i32, %c0_i32_0 : i32, i32
  }
  func.func @transform_3(%arg0: i32, %arg1: i32) -> (i32, i32) {
    %c0_i32 = arith.constant 0 : i32
    %c0_i32_0 = arith.constant 0 : i32
    %c0_i32_1 = arith.constant 0 : i32
    return %c0_i32, %c0_i32_0 : i32, i32
  }
  func.func @transform_4(%arg0: i32, %arg1: i32) -> (i32, i32) {
    %c0_i32 = arith.constant 0 : i32
    %c0_i32_0 = arith.constant 0 : i32
    %c0_i32_1 = arith.constant 0 : i32
    return %c0_i32, %c0_i32_0 : i32, i32
  }
  func.func @transform_5(%arg0: i32, %arg1: i32) -> (i32, i32) {
    %c0_i32 = arith.constant 0 : i32
    %c0_i32_0 = arith.constant 0 : i32
    %c0_i32_1 = arith.constant 0 : i32
    return %c0_i32, %c0_i32_0 : i32, i32
  }
  func.func @transform_6(%arg0: i32, %arg1: i32) -> (i32, i32) {
    %c0_i32 = arith.constant 0 : i32
    %c0_i32_0 = arith.constant 0 : i32
    return %arg0, %c0_i32 : i32, i32
  }
}

module attributes {stable_mosaic.version = 11 : i64} {
  func.func @_fused_pool_heads_kernel(%arg0: i32, %arg1: i32, %arg2: memref<16x16x128xbf16, #tpu.memory_space<vmem>>, %arg3: memref<16x1xf32, #tpu.memory_space<vmem>>, %arg4: memref<128x128xbf16, #tpu.memory_space<vmem>>, %arg5: memref<1x128xf32, #tpu.memory_space<vmem>>, %arg6: memref<128x128xbf16, #tpu.memory_space<vmem>>, %arg7: memref<1x128xf32, #tpu.memory_space<vmem>>, %arg8: memref<16x128xf32, #tpu.memory_space<vmem>>, %arg9: memref<16x128xf32, #tpu.memory_space<vmem>>) attributes {dimension_semantics = [#tpu.dimension_semantics<parallel>, #tpu.dimension_semantics<arbitrary>], iteration_bounds = array<i64: 1, 1>, scalar_prefetch = 0 : i64, scratch_operands = 1 : i64, tpu.core_type = #tpu.core_type<tc>, window_params = [{transform_indices = @transform_0, window_bounds = array<i64: 16, 16, 128>}, {transform_indices = @transform_1, window_bounds = array<i64: 16, 1>}, {pipeline_mode = #tpu.pipeline_mode<synchronous>, transform_indices = @transform_2, window_bounds = array<i64: 128, 128>}, {pipeline_mode = #tpu.pipeline_mode<synchronous>, transform_indices = @transform_3, window_bounds = array<i64: 1, 128>}, {pipeline_mode = #tpu.pipeline_mode<synchronous>, transform_indices = @transform_4, window_bounds = array<i64: 128, 128>}, {pipeline_mode = #tpu.pipeline_mode<synchronous>, transform_indices = @transform_5, window_bounds = array<i64: 1, 128>}, {transform_indices = @transform_6, window_bounds = array<i64: 16, 128>}]} {
    %c0_i32 = arith.constant 0 : i32
    %0 = arith.cmpi eq, %arg1, %c0_i32 : i32
    %1 = arith.extui %0 : i1 to i32
    %c0_i32_0 = arith.constant 0 : i32
    %2 = arith.cmpi ne, %1, %c0_i32_0 : i32
    scf.if %2 {
      %cst_9 = arith.constant 0.000000e+00 : f32
      %12 = vector.broadcast %cst_9 : f32 to vector<16x128xf32>
      %c0_10 = arith.constant 0 : index
      %c0_11 = arith.constant 0 : index
      %13 = vector.load %arg9[%c0_10, %c0_11] : memref<16x128xf32, #tpu.memory_space<vmem>>, vector<16x128xf32>
      tpu.vector_store %arg9[%c0_10, %c0_11], %12 {strides = array<i32>} : memref<16x128xf32, #tpu.memory_space<vmem>>, vector<16x128xf32>,
    } else {
    }
    %c0 = arith.constant 0 : index
    %c0_1 = arith.constant 0 : index
    %3 = vector.load %arg9[%c0, %c0_1] : memref<16x128xf32, #tpu.memory_space<vmem>>, vector<16x128xf32>
    %c0_2 = arith.constant 0 : index
    %c0_3 = arith.constant 0 : index
    %c0_4 = arith.constant 0 : index
    %4 = vector.load %arg2[%c0_2, %c0_3, %c0_4] : memref<16x16x128xbf16, #tpu.memory_space<vmem>>, vector<16x16x128xbf16>
    %5 = arith.extf %4 : vector<16x16x128xbf16> to vector<16x16x128xf32>
    %cst = arith.constant dense<0.000000e+00> : vector<16x128xf32>
    %6 = vector.multi_reduction <add>, %5, %cst [1] : vector<16x16x128xf32> to vector<16x128xf32>
    %7 = arith.addf %3, %6 : vector<16x128xf32>
    %c0_5 = arith.constant 0 : index
    %c0_6 = arith.constant 0 : index
    %8 = vector.load %arg9[%c0_5, %c0_6] : memref<16x128xf32, #tpu.memory_space<vmem>>, vector<16x128xf32>
    tpu.vector_store %arg9[%c0_5, %c0_6], %7 {strides = array<i32>} : memref<16x128xf32, #tpu.memory_space<vmem>>, vector<16x128xf32>,
    %c0_i32_7 = arith.constant 0 : i32
    %9 = arith.cmpi eq, %arg1, %c0_i32_7 : i32
    %10 = arith.extui %9 : i1 to i32
    %c0_i32_8 = arith.constant 0 : i32
    %11 = arith.cmpi ne, %10, %c0_i32_8 : i32
    scf.if %11 {
      %c0_9 = arith.constant 0 : index
      %c0_10 = arith.constant 0 : index
      %12 = vector.load %arg9[%c0_9, %c0_10] : memref<16x128xf32, #tpu.memory_space<vmem>>, vector<16x128xf32>
      %c0_11 = arith.constant 0 : index
      %c0_12 = arith.constant 0 : index
      %13 = vector.load %arg3[%c0_11, %c0_12] : memref<16x1xf32, #tpu.memory_space<vmem>>, vector<16x1xf32>
      %14 = vector.broadcast %13 : vector<16x1xf32> to vector<16x128xf32>
      %15 = arith.mulf %12, %14 : vector<16x128xf32>
      %16 = arith.truncf %15 : vector<16x128xf32> to vector<16x128xbf16>
      %c0_13 = arith.constant 0 : index
      %c0_14 = arith.constant 0 : index
      %17 = vector.load %arg4[%c0_13, %c0_14] : memref<128x128xbf16, #tpu.memory_space<vmem>>, vector<128x128xbf16>
      %cst_15 = arith.constant dense<0.000000e+00> : vector<16x128xf32>
      %18 = tpu.matmul %16, %17, %cst_15 {dimension_numbers = #tpu.dot_dimension_numbers<[1], [0], [0], [1], [0, 0, 1, 1], [], []>} : vector<16x128xbf16>, vector<128x128xbf16>, vector<16x128xf32> -> vector<16x128xf32>
      %c0_16 = arith.constant 0 : index
      %c0_17 = arith.constant 0 : index
      %19 = vector.load %arg5[%c0_16, %c0_17] : memref<1x128xf32, #tpu.memory_space<vmem>>, vector<1x128xf32>
      %20 = vector.broadcast %19 : vector<1x128xf32> to vector<16x128xf32>
      %21 = arith.addf %18, %20 : vector<16x128xf32>
      %22 = math.tanh %21 : vector<16x128xf32>
      %23 = arith.truncf %22 : vector<16x128xf32> to vector<16x128xbf16>
      %c0_18 = arith.constant 0 : index
      %c0_19 = arith.constant 0 : index
      %24 = vector.load %arg6[%c0_18, %c0_19] : memref<128x128xbf16, #tpu.memory_space<vmem>>, vector<128x128xbf16>
      %cst_20 = arith.constant dense<0.000000e+00> : vector<16x128xf32>
      %25 = tpu.matmul %23, %24, %cst_20 {dimension_numbers = #tpu.dot_dimension_numbers<[1], [0], [0], [1], [0, 0, 1, 1], [], []>} : vector<16x128xbf16>, vector<128x128xbf16>, vector<16x128xf32> -> vector<16x128xf32>
      %c0_21 = arith.constant 0 : index
      %c0_22 = arith.constant 0 : index
      %26 = vector.load %arg7[%c0_21, %c0_22] : memref<1x128xf32, #tpu.memory_space<vmem>>, vector<1x128xf32>
      %27 = vector.broadcast %26 : vector<1x128xf32> to vector<16x128xf32>
      %28 = arith.addf %25, %27 : vector<16x128xf32>
      %c0_23 = arith.constant 0 : index
      %c0_24 = arith.constant 0 : index
      %29 = vector.load %arg8[%c0_23, %c0_24] : memref<16x128xf32, #tpu.memory_space<vmem>>, vector<16x128xf32>
      tpu.vector_store %arg8[%c0_23, %c0_24], %28 {strides = array<i32>} : memref<16x128xf32, #tpu.memory_space<vmem>>, vector<16x128xf32>,
    } else {
    }
    return
  }
  func.func @transform_0(%arg0: i32, %arg1: i32) -> (i32, i32, i32) {
    %c0_i32 = arith.constant 0 : i32
    %c0_i32_0 = arith.constant 0 : i32
    return %arg0, %arg1, %c0_i32 : i32, i32, i32
  }
  func.func @transform_1(%arg0: i32, %arg1: i32) -> (i32, i32) {
    %c0_i32 = arith.constant 0 : i32
    %c0_i32_0 = arith.constant 0 : i32
    return %arg0, %c0_i32 : i32, i32
  }
  func.func @transform_2(%arg0: i32, %arg1: i32) -> (i32, i32) {
    %c0_i32 = arith.constant 0 : i32
    %c0_i32_0 = arith.constant 0 : i32
    %c0_i32_1 = arith.constant 0 : i32
    return %c0_i32, %c0_i32_0 : i32, i32
  }
  func.func @transform_3(%arg0: i32, %arg1: i32) -> (i32, i32) {
    %c0_i32 = arith.constant 0 : i32
    %c0_i32_0 = arith.constant 0 : i32
    %c0_i32_1 = arith.constant 0 : i32
    return %c0_i32, %c0_i32_0 : i32, i32
  }
  func.func @transform_4(%arg0: i32, %arg1: i32) -> (i32, i32) {
    %c0_i32 = arith.constant 0 : i32
    %c0_i32_0 = arith.constant 0 : i32
    %c0_i32_1 = arith.constant 0 : i32
    return %c0_i32, %c0_i32_0 : i32, i32
  }
  func.func @transform_5(%arg0: i32, %arg1: i32) -> (i32, i32) {
    %c0_i32 = arith.constant 0 : i32
    %c0_i32_0 = arith.constant 0 : i32
    %c0_i32_1 = arith.constant 0 : i32
    return %c0_i32, %c0_i32_0 : i32, i32
  }
  func.func @transform_6(%arg0: i32, %arg1: i32) -> (i32, i32) {
    %c0_i32 = arith.constant 0 : i32
    %c0_i32_0 = arith.constant 0 : i32
    return %arg0, %c0_i32 : i32, i32
  }
}

</mosaic_0001>

<bundles_post_ra>
// kernel: tpu_custom_call.1
= control target key start
LH: loop header
LB: loop body
LE: loop exit
PB: predicated region body
PF: predicated region fallthrough
CT: control target
= control target key end

     0   :  { %11 = vsyncpa [#allocation4], 0  ;;  %s866_s0 = inlined_call_operand.hbm [shape: bf16[16,16,128], index: 0, kind: input, shape index: {}]   ;;  %s867_s1 = inlined_call_operand.vmem [shape: f32[16,1], index: 1, kind: input, shape index: {}]   ;;  %s868_s2 = inlined_call_operand.hbm [shape: bf16[128,128], index: 2, kind: input, shape index: {}]   ;;  %s869_s3 = inlined_call_operand.vmem [shape: f32[1,128], index: 3, kind: input, shape index: {}]   ;;  %s870_s4 = inlined_call_operand.hbm [shape: bf16[128,128], index: 4, kind: input, shape index: {}]   ;;  %s871_s5 = inlined_call_operand.vmem [shape: f32[1,128], index: 5, kind: input, shape index: {}]   ;;  %s872_s6 = inlined_call_operand.hbm [shape: f32[16,128], index: 6, kind: output, shape index: {}]  }
   0x1   :  { %12 = vsyncpa [#allocation7], 0 }
   0x2   :  { %13 = vsyncpa [#allocation5], 0  ;;  %s33_s23 = sshll.u32 %s868_s2, 4  ;;  %s784_s24 = smov [#allocation6]   ;;  %s34_s23 = int_to_ptr.hbm [resolvable:$true] %s33_s23 }
   0x3   :  { %s35_s25 = sshll.u32 %s784_s24, 4  ;;  %s18_s28 = sshll.u32 %s866_s0, 4  ;;  %s36_s25 = int_to_ptr.vmem [resolvable:$true] %s35_s25  ;;  %s19_s28 = int_to_ptr.hbm [resolvable:$true] %s18_s28 }
   0x4   :  { %s785_s29 = smov 64   ;;  %s786_s30 = smov 4  }
   0x5   :  { %41 = dma.hbm_to_vmem [thread:$0]  %s34_s23, 1024, %s36_s25, [#allocation7], %s785_s29, %s785_s29, %s786_s30  }
   0x6   :  { %s787_s7 = smov [#allocation3]   ;;  %s48_s11 = sshll.u32 %s870_s4, 4  ;;  %s49_s11 = int_to_ptr.hbm [resolvable:$true] %s48_s11 }
   0x7   :  { %s20_s8 = sshll.u32 %s787_s7, 4  ;;  %s788_s2 = smov [#allocation8]   ;;  %s21_s8 = int_to_ptr.vmem [resolvable:$true] %s20_s8 }
   0x8   :  { %26 = dma.hbm_to_vmem [thread:$0]  %s19_s28, 2048, %s21_s8, [#allocation4], %s785_s29, %s785_s29, %s786_s30  }
   0x9   :  { %s50_s12 = sshll.u32 %s788_s2, 4  ;;  %s51_s12 = int_to_ptr.vmem [resolvable:$true] %s50_s12 }
   0xa   :  { %56 = dma.hbm_to_vmem [thread:$0]  %s49_s11, 1024, %s51_s12, [#allocation7], %s785_s29, %s785_s29, %s786_s30  }
   0xb   :  { %778 = dma.done.wait [#allocation4], 2048  }
   0xc   :  { %779 = vsyncadd [#allocation4], 4294965248 }
   0xd   :  { %780 = dma.done.wait [#allocation7], 2048  }
   0xe   :  { %781 = vsyncadd [#allocation7], 4294965248  ;;  %v789_v0 = vmov 0   ;;  %v303_v1 = vld [vmem:[%s867_s1] sm:$0xff]  ;;  %v578_v2 = vld [vmem:[#allocation6 + $0x38] sm:$0xff]  ;;  %vm271_vm0 = vcmask 1041409  }
   0xf   :  { %675 = vset.pattern.permute.xlu0 %v789_v0  ;;  %386 = vmatpush.bf16.msra.mxu0 %v578_v2  ;;  %v577_v3 = vld [vmem:[#allocation6 + $0x30] sm:$0xff]  ;;  %v304_v4 = vld [vmem:[%s867_s1 + $0x8] sm:$0xff]  ;;  %v575_v6 = vld [vmem:[#allocation6 + $0x20] sm:$0xff]  ;;  %vm273_vm1 = vcmask 1042434   ;;  %vm275_vm2 = vcmask 1043459   ;;  %vm277_vm3 = vcmask 1044484  }
  0x10   :  { %307 = vperm.xlu0 %675, %v303_v1   ;;  %v576_v5 = vld [vmem:[#allocation6 + $0x28] sm:$0xff]  ;;  %v574_v7 = vld [vmem:[#allocation6 + $0x18] sm:$0xff]  ;;  %v588_v8 = vld [vmem:[#allocation3] sm:$0xff]   ;;  %vm279_vm4 = vcmask 1045509   ;;  %vm281_vm5 = vcmask 1046534   ;;  %vm283_vm6 = vcmask 1047559  }
  0x11   :  { %v651_v9 = vld [vmem:[#allocation3 + $0x8] sm:$0xff]   ;;  %v589_v10 = vunpack.c.l.bf16 %v588_v8  ;;  %v590_v11 = vunpack.c.h.bf16 %v588_v8  ;;  %v652_v14 = vld [vmem:[#allocation3 + $0x10] sm:$0xff]   ;;  %v653_v17 = vld [vmem:[#allocation3 + $0x18] sm:$0xff]   ;;  %s790_s18 = smov [#allocation9]   ;;  %s493_s21 = sshll.u32 %s872_s6, 4  ;;  %s494_s21 = int_to_ptr.hbm [resolvable:$true] %s493_s21 }
  0x12   :  { %v593_v12 = vunpack.c.l.bf16 %v651_v9  ;;  %v594_v13 = vunpack.c.h.bf16 %v651_v9  ;;  %v597_v15 = vunpack.c.l.bf16 %v652_v14  ;;  %v598_v16 = vunpack.c.h.bf16 %v652_v14  ;;  %v654_v23 = vld [vmem:[#allocation3 + $0x20] sm:$0xff]   ;;  %v655_v26 = vld [vmem:[#allocation3 + $0x28] sm:$0xff]   ;;  %v656_v29 = vld [vmem:[#allocation3 + $0x30] sm:$0xff]   ;;  %s491_s19 = sshll.u32 %s790_s18, 4  ;;  %s791_s22 = smov 128   ;;  %s492_s19 = int_to_ptr.vmem [resolvable:$true] %s491_s19 }
  0x13   :  { %387 = vmatpush.bf16.msra.mxu0 %v577_v3  ;;  %v143_v18 = vadd.f32 %v590_v11, %v589_v10  ;;  %v601_v20 = vunpack.c.l.bf16 %v653_v17  ;;  %v602_v21 = vunpack.c.h.bf16 %v653_v17  ;;  %v605_v27 = vunpack.c.l.bf16 %v654_v23  ;;  %v657_v30 = vld [vmem:[#allocation3 + $0x38] sm:$0xff]   ;;  %v658_v37 = vld [vmem:[#allocation3 + $0x40] sm:$0xff]   ;;  %v659_v41 = vld [vmem:[#allocation3 + $0x48] sm:$0xff]   ;;  %s792_s23 = smov 8  }
  0x14   :  { %v150_v19 = vadd.f32 %v594_v13, %v593_v12  ;;  %v157_v22 = vadd.f32 %v598_v16, %v597_v15  ;;  %v606_v28 = vunpack.c.h.bf16 %v654_v23  ;;  %v609_v33 = vunpack.c.l.bf16 %v655_v26  ;;  %v660_v42 = vld [vmem:[#allocation3 + $0x50] sm:$0xff]   ;;  %v661_v47 = vld [vmem:[#allocation3 + $0x58] sm:$0xff]   ;;  %v662_v48 = vld [vmem:[#allocation3 + $0x60] sm:$0xff]  }
  0x15   :  { %v144_v24 = vrot.slane %v143_v18, 4  ;;  %v164_v32 = vadd.f32 %v602_v21, %v601_v20  ;;  %v610_v34 = vunpack.c.h.bf16 %v655_v26  ;;  %v613_v38 = vunpack.c.l.bf16 %v656_v29  ;;  %v663_v53 = vld [vmem:[#allocation3 + $0x68] sm:$0xff]   ;;  %v664_v62 = vld [vmem:[#allocation3 + $0x70] sm:$0xff]   ;;  %v665_v14 = vld [vmem:[#allocation3 + $0x78] sm:$0xff]  }
  0x16   :  { %v151_v25 = vrot.slane %v150_v19, 4  ;;  %v158_v31 = vrot.slane %v157_v22, 4  ;;  %v614_v39 = vunpack.c.h.bf16 %v656_v29  ;;  %v617_v40 = vunpack.c.l.bf16 %v657_v30  ;;  %v573_v0 = vld [vmem:[#allocation6 + $0x10] sm:$0xff]  ;;  %v572_v9 = vld [vmem:[#allocation6 + $0x8] sm:$0xff] }
  0x17   :  { %388 = vmatpush.bf16.msra.mxu0 %v576_v5  ;;  %v145_v35 = vadd.f32 %v144_v24, %v143_v18  ;;  %v618_v43 = vunpack.c.h.bf16 %v657_v30  ;;  %v165_v45 = vrot.slane %v164_v32, 4  ;;  %v171_v46 = vadd.f32 %v606_v28, %v605_v27 }
  0x18   :  { %312 = vperm.xlu0 %675, %v304_v4   ;;  %v152_v36 = vadd.f32 %v151_v25, %v150_v19  ;;  %v159_v44 = vadd.f32 %v158_v31, %v157_v22  ;;  %v843_v51 = vadd.f32 %v610_v34, %v609_v33  ;;  %v621_v52 = vunpack.c.l.bf16 %v658_v37 }
  0x19   :  { %v146_v49 = vrot.slane %v145_v35, 2  ;;  %v622_v54 = vunpack.c.h.bf16 %v658_v37  ;;  %v625_v55 = vunpack.c.l.bf16 %v659_v41  ;;  %v626_v56 = vunpack.c.h.bf16 %v659_v41 }
  0x1a   :  { %v153_v50 = vrot.slane %v152_v36, 2  ;;  %v629_v57 = vunpack.c.l.bf16 %v660_v42  ;;  %v630_v58 = vunpack.c.h.bf16 %v660_v42  ;;  %v633_v59 = vunpack.c.l.bf16 %v661_v47 }
  0x1b   :  { %389 = vmatpush.bf16.msra.mxu0 %v575_v6  ;;  %v634_v60 = vunpack.c.h.bf16 %v661_v47  ;;  %v637_v61 = vunpack.c.l.bf16 %v662_v48  ;;  %v185_v63 = vadd.f32 %v614_v39, %v613_v38  ;;  %v638_v1 = vunpack.c.h.bf16 %v662_v48  ;;  %v571_v39 = vld [vmem:[#allocation6] sm:$0xff] }
  0x1c   :  { %v641_v2 = vunpack.c.l.bf16 %v663_v53  ;;  %v642_v3 = vunpack.c.h.bf16 %v663_v53  ;;  %v160_v4 = vrot.slane %v159_v44, 2  ;;  %v166_v5 = vadd.f32 %v165_v45, %v164_v32 }
  0x1d   :  { %v172_v6 = vrot.slane %v171_v46, 4  ;;  %v179_v8 = vrot.slane %v843_v51, 4  ;;  %v645_v10 = vunpack.c.l.bf16 %v664_v62  ;;  %v199_v11 = vadd.f32 %v622_v54, %v621_v52 }
  0x1e   :  { %v206_v12 = vadd.f32 %v626_v56, %v625_v55  ;;  %v646_v13 = vunpack.c.h.bf16 %v664_v62  ;;  %v213_v15 = vadd.f32 %v630_v58, %v629_v57  ;;  %v220_v16 = vadd.f32 %v634_v60, %v633_v59  ;;  %v586_v60 = vld [vmem:[#allocation8 + $0x38] sm:$0xff] }
  0x1f   :  { %390 = vmatpush.bf16.msra.mxu0 %v574_v7  ;;  %v845_v7 = vadd.f32 %v618_v43, %v617_v40  ;;  %v227_v17 = vadd.f32 %v638_v1, %v637_v61  ;;  %v147_v18 = vadd.f32 %v146_v49, %v145_v35  ;;  %v200_v19 = vrot.slane %v199_v11, 4  ;;  %471 = vmatpush.bf16.msra.mxu1 %v586_v60 }
  0x20   :  { %v207_v20 = vrot.slane %v206_v12, 4  ;;  %v234_v21 = vadd.f32 %v642_v3, %v641_v2  ;;  %v154_v22 = vadd.f32 %v153_v50, %v152_v36  ;;  %v214_v23 = vrot.slane %v213_v15, 4 }
  0x21   :  { %v221_v24 = vrot.slane %v220_v16, 4  ;;  %v228_v25 = vrot.slane %v227_v17, 4  ;;  %v649_v26 = vunpack.c.l.bf16 %v665_v14  ;;  %v650_v27 = vunpack.c.h.bf16 %v665_v14 }
  0x22   :  { %v201_v28 = vadd.f32 %v200_v19, %v199_v11  ;;  %v208_v29 = vadd.f32 %v207_v20, %v206_v12  ;;  %v186_v30 = vrot.slane %v185_v63, 4  ;;  %v215_v31 = vadd.f32 %v214_v23, %v213_v15  ;;  %v584_v20 = vld [vmem:[#allocation8 + $0x28] sm:$0xff] }
  0x23   :  { %391 = vmatpush.bf16.msra.mxu0 %v573_v0  ;;  %v222_v32 = vadd.f32 %v221_v24, %v220_v16  ;;  %v241_v33 = vadd.f32 %v646_v13, %v645_v10  ;;  %v161_v34 = vadd.f32 %v160_v4, %v159_v44  ;;  %v235_v35 = vrot.slane %v234_v21, 4 }
  0x24   :  { %v202_v37 = vrot.slane %v201_v28, 2  ;;  %v209_v38 = vrot.slane %v208_v29, 2  ;;  %v167_v40 = vrot.slane %v166_v5, 2  ;;  %v173_v41 = vadd.f32 %v172_v6, %v171_v46  ;;  %v585_v6 = vld [vmem:[#allocation8 + $0x30] sm:$0xff] }
  0x25   :  { %v216_v36 = vrot.slane %v215_v31, 2  ;;  %v229_v42 = vadd.f32 %v228_v25, %v227_v17  ;;  %v223_v47 = vrot.slane %v222_v32, 2  ;;  %v248_v48 = vadd.f32 %v650_v27, %v649_v26  ;;  %472 = vmatpush.bf16.msra.mxu1 %v585_v6  ;;  %v580_v6 = vld [vmem:[#allocation8 + $0x8] sm:$0xff] }
  0x26   :  { %v203_v43 = vadd.f32 %v202_v37, %v201_v28  ;;  %v210_v45 = vadd.f32 %v209_v38, %v208_v29  ;;  %v148_v49 = vrot.slane %v147_v18, 1  ;;  %v180_v50 = vadd.f32 %v179_v8, %v843_v51 }
  0x27   :  { %392 = vmatpush.bf16.msra.mxu0 %v572_v9  ;;  %v217_v52 = vadd.f32 %v216_v36, %v215_v31  ;;  %v242_v53 = vrot.slane %v241_v33, 4  ;;  %v155_v54 = vrot.slane %v154_v22, 1  ;;  %v236_v56 = vadd.f32 %v235_v35, %v234_v21 }
  0x28   :  { %v204_v44 = vrot.slane %v203_v43, 1  ;;  %v211_v55 = vrot.slane %v210_v45, 1  ;;  %v174_v57 = vrot.slane %v173_v41, 2  ;;  %v187_v58 = vadd.f32 %v186_v30, %v185_v63 }
  0x29   :  { %v193_v46 = vrot.slane %v845_v7, 4  ;;  %v230_v59 = vrot.slane %v229_v42, 2  ;;  %v162_v61 = vrot.slane %v161_v34, 1  ;;  %v168_v62 = vadd.f32 %v167_v40, %v166_v5  ;;  %473 = vmatpush.bf16.msra.mxu1 %v584_v20 }
  0x2a   :  { %v224_v0 = vadd.f32 %v223_v47, %v222_v32  ;;  %v249_v1 = vrot.slane %v248_v48, 4  ;;  %v149_v2 = vadd.f32 %v148_v49, %v147_v18  ;;  %v181_v3 = vrot.slane %v180_v50, 2 }
  0x2b   :  { %393 = vmatpush.bf16.msra.mxu0 %v571_v39  ;;  %v218_v4 = vrot.slane %v217_v52, 1  ;;  %v243_v51 = vadd.f32 %v242_v53, %v241_v33  ;;  %v156_v8 = vadd.f32 %v155_v54, %v154_v22  ;;  %v205_v9 = vadd.f32 %v204_v44, %v203_v43 }
  0x2c   :  { %v212_v10 = vadd.f32 %v211_v55, %v210_v45  ;;  %v237_v11 = vrot.slane %v236_v56, 2  ;;  %v175_v63 = vadd.f32 %v174_v57, %v173_v41  ;;  %v231_v12 = vadd.f32 %v230_v59, %v229_v42 }
  0x2d   :  { %v169_v13 = vrot.slane %v168_v62, 1  ;;  %v194_v14 = vadd.f32 %v193_v46, %v845_v7  ;;  %v225_v5 = vrot.slane %v224_v0, 1  ;;  %v250_v15 = vadd.f32 %v249_v1, %v248_v48 }
  0x2e   :  { %v163_v16 = vadd.f32 %v162_v61, %v161_v34  ;;  %v188_v17 = vrot.slane %v187_v58, 2  ;;  %v219_v18 = vadd.f32 %v218_v4, %v217_v52  ;;  %v244_v19 = vrot.slane %v243_v51, 2  ;;  %v582_v4 = vld [vmem:[#allocation8 + $0x18] sm:$0xff] }
  0x2f   :  { %v182_v21 = vadd.f32 %v181_v3, %v180_v50  ;;  %v272_v22 = vsel %vm271_vm0, %v156_v8, %v149_v2  ;;  %v238_v23 = vadd.f32 %v237_v11, %v236_v56  ;;  %v285_v24 = vsel %vm271_vm0, %v212_v10, %v205_v9  ;;  %v583_v3 = vld [vmem:[#allocation8 + $0x20] sm:$0xff] }
  0x30   :  { %v176_v25 = vrot.slane %v175_v63, 1  ;;  %v232_v26 = vrot.slane %v231_v12, 1  ;;  %v170_v27 = vadd.f32 %v169_v13, %v168_v62  ;;  %v195_v28 = vrot.slane %v194_v14, 2  ;;  %474 = vmatpush.bf16.msra.mxu1 %v583_v3  ;;  %v579_v8 = vld [vmem:[#allocation8] sm:$0xff] }
  0x31   :  { %v226_v7 = vadd.f32 %v225_v5, %v224_v0  ;;  %v251_v29 = vrot.slane %v250_v15, 2  ;;  %v189_v30 = vadd.f32 %v188_v17, %v187_v58  ;;  %v274_v31 = vsel %vm273_vm1, %v163_v16, %v272_v22  ;;  %v676_v10 = vld [vmem:[%s869_s3] ss:$0 sm:$0xff] }
  0x32   :  { %v245_v32 = vadd.f32 %v244_v19, %v243_v51  ;;  %v286_v33 = vsel %vm273_vm1, %v219_v18, %v285_v24  ;;  %v183_v34 = vrot.slane %v182_v21, 1  ;;  %v239_v37 = vrot.slane %v238_v23, 1  ;;  %v581_v51 = vld [vmem:[#allocation8 + $0x10] sm:$0xff] }
  0x33   :  { %v177_v38 = vadd.f32 %v176_v25, %v175_v63  ;;  %v233_v35 = vadd.f32 %v232_v26, %v231_v12  ;;  %v196_v39 = vadd.f32 %v195_v28, %v194_v14  ;;  %v276_v40 = vsel %vm275_vm2, %v170_v27, %v274_v31 }
  0x34   :  { %v252_v41 = vadd.f32 %v251_v29, %v250_v15  ;;  %v287_v36 = vsel %vm275_vm2, %v226_v7, %v286_v33  ;;  %v190_v42 = vrot.slane %v189_v30, 1  ;;  %v246_v43 = vrot.slane %v245_v32, 1  ;;  %475 = vmatpush.bf16.msra.mxu1 %v582_v4  ;;  %v677_v15 = vld [vmem:[%s871_s5] ss:$0 sm:$0xff] }
  0x35   :  { %v184_v45 = vadd.f32 %v183_v34, %v182_v21  ;;  %v240_v47 = vadd.f32 %v239_v37, %v238_v23  ;;  %v278_v48 = vsel %vm277_vm3, %v177_v38, %v276_v40  ;;  %v288_v49 = vsel %vm277_vm3, %v233_v35, %v287_v36 }
  0x36   :  { %v197_v50 = vrot.slane %v196_v39, 1  ;;  %v253_v52 = vrot.slane %v252_v41, 1  ;;  %v191_v53 = vadd.f32 %v190_v42, %v189_v30  ;;  %v247_v54 = vadd.f32 %v246_v43, %v245_v32 }
  0x37   :  { %v280_v55 = vsel %vm279_vm4, %v184_v45, %v278_v48  ;;  %v289_v56 = vsel %vm279_vm4, %v240_v47, %v288_v49 }
  0x38   :  { %v198_v57 = vadd.f32 %v197_v50, %v196_v39  ;;  %v254_v58 = vadd.f32 %v253_v52, %v252_v41  ;;  %v282_v46 = vsel %vm281_vm5, %v191_v53, %v280_v55  ;;  %v290_v59 = vsel %vm281_vm5, %v247_v54, %v289_v56  ;;  %476 = vmatpush.bf16.msra.mxu1 %v581_v51 }
  0x3a   :  { %v284_v60 = vsel %vm283_vm6, %v198_v57, %v282_v46  ;;  %v291_v61 = vsel %vm283_vm6, %v254_v58, %v290_v59 }
  0x3c   :  { %477 = vmatpush.bf16.msra.mxu1 %v580_v6 }
  0x40   :  { %478 = vmatpush.bf16.msra.mxu1 %v579_v8 }
  0x82   :  { %v308_v44 = vpop.permute.xlu0 %307 }
  0x83   :  { %v315_v0 = vmul.f32 %v308_v44, %v284_v60 }
  0x8a   :  { %v313_v62 = vpop.permute.xlu0 %312 }
  0x8b   :  { %v316_v1 = vmul.f32 %v313_v62, %v291_v61 }
  0x8d   :  { %v317_v2 = vpack.c.bf16 %v316_v1, %v315_v0 }
  0x8f   :  { %394 = vmatmul.bf16.vlgmr.msra.gmra.mxu0 %v317_v2 }
 0x10c   :  { %v395_v9 = vpop.f32.mrf.mxu0 }
 0x10d   :  { %v396_v11 = vadd.f32 %v676_v10, %v395_v9 }
 0x10f   :  { %678 = vtanh.f32 %v396_v11 }
 0x114   :  { %v397_v63 = vpop.f32.mrf.mxu0 }
 0x115   :  { %v398_v12 = vadd.f32 %v676_v10, %v397_v63  ;;  %v679_v13 = vpop.eup %678 }
 0x117   :  { %680 = vtanh.f32 %v398_v12 }
 0x11d   :  { %v681_v14 = vpop.eup %680 }
 0x11e   :  { %v402_v5 = vpack.c.bf16 %v681_v14, %v679_v13 }
 0x120   :  { %479 = vmatmul.bf16.vlgmr.msra.gmra.mxu1 %v402_v5 }
 0x19d   :  { %v480_v16 = vpop.f32.mrf.mxu1 }
 0x19e   :  { %v481_v17 = vadd.f32 %v677_v15, %v480_v16 }
 0x1a0   :  { %485 = vst [vmem:[#allocation9] sm:$0xff] %v481_v17 }
 0x1a5   :  { %v482_v18 = vpop.f32.mrf.mxu1 }
 0x1a6   :  { %v483_v19 = vadd.f32 %v677_v15, %v482_v18 }
 0x1a8   :  { %486 = vst [vmem:[#allocation9 + $0x8] sm:$0xff] %v483_v19 }
 0x1a9   :  { %499 = dma.vmem_to_hbm [thread:$0]  %s492_s19, 256, %s494_s21, [#allocation5], %s791_s22, %s791_s22, %s792_s23  }
 0x1aa   :  { %782 = dma.done.wait [#allocation5], 256  }
 0x1ab   :  { %783 = vsyncadd [#allocation5], 4294967040 }
 0x1ac   :  { %504 = vsyncpa [#allocation4], 1 }
 0x1ad   :  { %505 = vsyncpa [#allocation7], 1 }
 0x1ae   :  { %506 = vsyncpa [#allocation5], 1 }

// kernel: tpu_custom_call.1
= control target key start
LH: loop header
LB: loop body
LE: loop exit
PB: predicated region body
PF: predicated region fallthrough
CT: control target
= control target key end

     0   :  { %11 = vsyncpa [#allocation4], 0  ;;  %s866_s0 = inlined_call_operand.hbm [shape: bf16[16,16,128], index: 0, kind: input, shape index: {}]   ;;  %s867_s1 = inlined_call_operand.vmem [shape: f32[16,1], index: 1, kind: input, shape index: {}]   ;;  %s868_s2 = inlined_call_operand.hbm [shape: bf16[128,128], index: 2, kind: input, shape index: {}]   ;;  %s869_s3 = inlined_call_operand.vmem [shape: f32[1,128], index: 3, kind: input, shape index: {}]   ;;  %s870_s4 = inlined_call_operand.hbm [shape: bf16[128,128], index: 4, kind: input, shape index: {}]   ;;  %s871_s5 = inlined_call_operand.vmem [shape: f32[1,128], index: 5, kind: input, shape index: {}]   ;;  %s872_s6 = inlined_call_operand.hbm [shape: f32[16,128], index: 6, kind: output, shape index: {}]  }
   0x1   :  { %12 = vsyncpa [#allocation7], 0 }
   0x2   :  { %13 = vsyncpa [#allocation5], 0  ;;  %s33_s23 = sshll.u32 %s868_s2, 4  ;;  %s784_s24 = smov [#allocation6]   ;;  %s34_s23 = int_to_ptr.hbm [resolvable:$true] %s33_s23 }
   0x3   :  { %s35_s25 = sshll.u32 %s784_s24, 4  ;;  %s18_s28 = sshll.u32 %s866_s0, 4  ;;  %s36_s25 = int_to_ptr.vmem [resolvable:$true] %s35_s25  ;;  %s19_s28 = int_to_ptr.hbm [resolvable:$true] %s18_s28 }
   0x4   :  { %s785_s29 = smov 64   ;;  %s786_s30 = smov 4  }
   0x5   :  { %41 = dma.hbm_to_vmem [thread:$0]  %s34_s23, 1024, %s36_s25, [#allocation7], %s785_s29, %s785_s29, %s786_s30  }
   0x6   :  { %s787_s7 = smov [#allocation3]   ;;  %s48_s11 = sshll.u32 %s870_s4, 4  ;;  %s49_s11 = int_to_ptr.hbm [resolvable:$true] %s48_s11 }
   0x7   :  { %s20_s8 = sshll.u32 %s787_s7, 4  ;;  %s788_s2 = smov [#allocation8]   ;;  %s21_s8 = int_to_ptr.vmem [resolvable:$true] %s20_s8 }
   0x8   :  { %26 = dma.hbm_to_vmem [thread:$0]  %s19_s28, 2048, %s21_s8, [#allocation4], %s785_s29, %s785_s29, %s786_s30  }
   0x9   :  { %s50_s12 = sshll.u32 %s788_s2, 4  ;;  %s51_s12 = int_to_ptr.vmem [resolvable:$true] %s50_s12 }
   0xa   :  { %56 = dma.hbm_to_vmem [thread:$0]  %s49_s11, 1024, %s51_s12, [#allocation7], %s785_s29, %s785_s29, %s786_s30  }
   0xb   :  { %778 = dma.done.wait [#allocation4], 2048  }
   0xc   :  { %779 = vsyncadd [#allocation4], 4294965248 }
   0xd   :  { %780 = dma.done.wait [#allocation7], 2048  }
   0xe   :  { %781 = vsyncadd [#allocation7], 4294965248  ;;  %v789_v0 = vmov 0   ;;  %v303_v1 = vld [vmem:[%s867_s1] sm:$0xff]  ;;  %v578_v2 = vld [vmem:[#allocation6 + $0x38] sm:$0xff]  ;;  %vm271_vm0 = vcmask 1041409  }
   0xf   :  { %675 = vset.pattern.permute.xlu0 %v789_v0  ;;  %386 = vmatpush.bf16.msra.mxu0 %v578_v2  ;;  %v577_v3 = vld [vmem:[#allocation6 + $0x30] sm:$0xff]  ;;  %v304_v4 = vld [vmem:[%s867_s1 + $0x8] sm:$0xff]  ;;  %v575_v6 = vld [vmem:[#allocation6 + $0x20] sm:$0xff]  ;;  %vm273_vm1 = vcmask 1042434   ;;  %vm275_vm2 = vcmask 1043459   ;;  %vm277_vm3 = vcmask 1044484  }
  0x10   :  { %307 = vperm.xlu0 %675, %v303_v1   ;;  %v576_v5 = vld [vmem:[#allocation6 + $0x28] sm:$0xff]  ;;  %v574_v7 = vld [vmem:[#allocation6 + $0x18] sm:$0xff]  ;;  %v588_v8 = vld [vmem:[#allocation3] sm:$0xff]   ;;  %vm279_vm4 = vcmask 1045509   ;;  %vm281_vm5 = vcmask 1046534   ;;  %vm283_vm6 = vcmask 1047559  }
  0x11   :  { %v651_v9 = vld [vmem:[#allocation3 + $0x8] sm:$0xff]   ;;  %v589_v10 = vunpack.c.l.bf16 %v588_v8  ;;  %v590_v11 = vunpack.c.h.bf16 %v588_v8  ;;  %v652_v14 = vld [vmem:[#allocation3 + $0x10] sm:$0xff]   ;;  %v653_v17 = vld [vmem:[#allocation3 + $0x18] sm:$0xff]   ;;  %s790_s18 = smov [#allocation9]   ;;  %s493_s21 = sshll.u32 %s872_s6, 4  ;;  %s494_s21 = int_to_ptr.hbm [resolvable:$true] %s493_s21 }
  0x12   :  { %v593_v12 = vunpack.c.l.bf16 %v651_v9  ;;  %v594_v13 = vunpack.c.h.bf16 %v651_v9  ;;  %v597_v15 = vunpack.c.l.bf16 %v652_v14  ;;  %v598_v16 = vunpack.c.h.bf16 %v652_v14  ;;  %v654_v23 = vld [vmem:[#allocation3 + $0x20] sm:$0xff]   ;;  %v655_v26 = vld [vmem:[#allocation3 + $0x28] sm:$0xff]   ;;  %v656_v29 = vld [vmem:[#allocation3 + $0x30] sm:$0xff]   ;;  %s491_s19 = sshll.u32 %s790_s18, 4  ;;  %s791_s22 = smov 128   ;;  %s492_s19 = int_to_ptr.vmem [resolvable:$true] %s491_s19 }
  0x13   :  { %387 = vmatpush.bf16.msra.mxu0 %v577_v3  ;;  %v143_v18 = vadd.f32 %v590_v11, %v589_v10  ;;  %v601_v20 = vunpack.c.l.bf16 %v653_v17  ;;  %v602_v21 = vunpack.c.h.bf16 %v653_v17  ;;  %v605_v27 = vunpack.c.l.bf16 %v654_v23  ;;  %v657_v30 = vld [vmem:[#allocation3 + $0x38] sm:$0xff]   ;;  %v658_v37 = vld [vmem:[#allocation3 + $0x40] sm:$0xff]   ;;  %v659_v41 = vld [vmem:[#allocation3 + $0x48] sm:$0xff]   ;;  %s792_s23 = smov 8  }
  0x14   :  { %v150_v19 = vadd.f32 %v594_v13, %v593_v12  ;;  %v157_v22 = vadd.f32 %v598_v16, %v597_v15  ;;  %v606_v28 = vunpack.c.h.bf16 %v654_v23  ;;  %v609_v33 = vunpack.c.l.bf16 %v655_v26  ;;  %v660_v42 = vld [vmem:[#allocation3 + $0x50] sm:$0xff]   ;;  %v661_v47 = vld [vmem:[#allocation3 + $0x58] sm:$0xff]   ;;  %v662_v48 = vld [vmem:[#allocation3 + $0x60] sm:$0xff]  }
  0x15   :  { %v144_v24 = vrot.slane %v143_v18, 4  ;;  %v164_v32 = vadd.f32 %v602_v21, %v601_v20  ;;  %v610_v34 = vunpack.c.h.bf16 %v655_v26  ;;  %v613_v38 = vunpack.c.l.bf16 %v656_v29  ;;  %v663_v53 = vld [vmem:[#allocation3 + $0x68] sm:$0xff]   ;;  %v664_v62 = vld [vmem:[#allocation3 + $0x70] sm:$0xff]   ;;  %v665_v14 = vld [vmem:[#allocation3 + $0x78] sm:$0xff]  }
  0x16   :  { %v151_v25 = vrot.slane %v150_v19, 4  ;;  %v158_v31 = vrot.slane %v157_v22, 4  ;;  %v614_v39 = vunpack.c.h.bf16 %v656_v29  ;;  %v617_v40 = vunpack.c.l.bf16 %v657_v30  ;;  %v573_v0 = vld [vmem:[#allocation6 + $0x10] sm:$0xff]  ;;  %v572_v9 = vld [vmem:[#allocation6 + $0x8] sm:$0xff] }
  0x17   :  { %388 = vmatpush.bf16.msra.mxu0 %v576_v5  ;;  %v145_v35 = vadd.f32 %v144_v24, %v143_v18  ;;  %v618_v43 = vunpack.c.h.bf16 %v657_v30  ;;  %v165_v45 = vrot.slane %v164_v32, 4  ;;  %v171_v46 = vadd.f32 %v606_v28, %v605_v27 }
  0x18   :  { %312 = vperm.xlu0 %675, %v304_v4   ;;  %v152_v36 = vadd.f32 %v151_v25, %v150_v19  ;;  %v159_v44 = vadd.f32 %v158_v31, %v157_v22  ;;  %v843_v51 = vadd.f32 %v610_v34, %v609_v33  ;;  %v621_v52 = vunpack.c.l.bf16 %v658_v37 }
  0x19   :  { %v146_v49 = vrot.slane %v145_v35, 2  ;;  %v622_v54 = vunpack.c.h.bf16 %v658_v37  ;;  %v625_v55 = vunpack.c.l.bf16 %v659_v41  ;;  %v626_v56 = vunpack.c.h.bf16 %v659_v41 }
  0x1a   :  { %v153_v50 = vrot.slane %v152_v36, 2  ;;  %v629_v57 = vunpack.c.l.bf16 %v660_v42  ;;  %v630_v58 = vunpack.c.h.bf16 %v660_v42  ;;  %v633_v59 = vunpack.c.l.bf16 %v661_v47 }
  0x1b   :  { %389 = vmatpush.bf16.msra.mxu0 %v575_v6  ;;  %v634_v60 = vunpack.c.h.bf16 %v661_v47  ;;  %v637_v61 = vunpack.c.l.bf16 %v662_v48  ;;  %v185_v63 = vadd.f32 %v614_v39, %v613_v38  ;;  %v638_v1 = vunpack.c.h.bf16 %v662_v48  ;;  %v571_v39 = vld [vmem:[#allocation6] sm:$0xff] }
  0x1c   :  { %v641_v2 = vunpack.c.l.bf16 %v663_v53  ;;  %v642_v3 = vunpack.c.h.bf16 %v663_v53  ;;  %v160_v4 = vrot.slane %v159_v44, 2  ;;  %v166_v5 = vadd.f32 %v165_v45, %v164_v32 }
  0x1d   :  { %v172_v6 = vrot.slane %v171_v46, 4  ;;  %v179_v8 = vrot.slane %v843_v51, 4  ;;  %v645_v10 = vunpack.c.l.bf16 %v664_v62  ;;  %v199_v11 = vadd.f32 %v622_v54, %v621_v52 }
  0x1e   :  { %v206_v12 = vadd.f32 %v626_v56, %v625_v55  ;;  %v646_v13 = vunpack.c.h.bf16 %v664_v62  ;;  %v213_v15 = vadd.f32 %v630_v58, %v629_v57  ;;  %v220_v16 = vadd.f32 %v634_v60, %v633_v59  ;;  %v586_v60 = vld [vmem:[#allocation8 + $0x38] sm:$0xff] }
  0x1f   :  { %390 = vmatpush.bf16.msra.mxu0 %v574_v7  ;;  %v845_v7 = vadd.f32 %v618_v43, %v617_v40  ;;  %v227_v17 = vadd.f32 %v638_v1, %v637_v61  ;;  %v147_v18 = vadd.f32 %v146_v49, %v145_v35  ;;  %v200_v19 = vrot.slane %v199_v11, 4  ;;  %471 = vmatpush.bf16.msra.mxu1 %v586_v60 }
  0x20   :  { %v207_v20 = vrot.slane %v206_v12, 4  ;;  %v234_v21 = vadd.f32 %v642_v3, %v641_v2  ;;  %v154_v22 = vadd.f32 %v153_v50, %v152_v36  ;;  %v214_v23 = vrot.slane %v213_v15, 4 }
  0x21   :  { %v221_v24 = vrot.slane %v220_v16, 4  ;;  %v228_v25 = vrot.slane %v227_v17, 4  ;;  %v649_v26 = vunpack.c.l.bf16 %v665_v14  ;;  %v650_v27 = vunpack.c.h.bf16 %v665_v14 }
  0x22   :  { %v201_v28 = vadd.f32 %v200_v19, %v199_v11  ;;  %v208_v29 = vadd.f32 %v207_v20, %v206_v12  ;;  %v186_v30 = vrot.slane %v185_v63, 4  ;;  %v215_v31 = vadd.f32 %v214_v23, %v213_v15  ;;  %v584_v20 = vld [vmem:[#allocation8 + $0x28] sm:$0xff] }
  0x23   :  { %391 = vmatpush.bf16.msra.mxu0 %v573_v0  ;;  %v222_v32 = vadd.f32 %v221_v24, %v220_v16  ;;  %v241_v33 = vadd.f32 %v646_v13, %v645_v10  ;;  %v161_v34 = vadd.f32 %v160_v4, %v159_v44  ;;  %v235_v35 = vrot.slane %v234_v21, 4 }
  0x24   :  { %v202_v37 = vrot.slane %v201_v28, 2  ;;  %v209_v38 = vrot.slane %v208_v29, 2  ;;  %v167_v40 = vrot.slane %v166_v5, 2  ;;  %v173_v41 = vadd.f32 %v172_v6, %v171_v46  ;;  %v585_v6 = vld [vmem:[#allocation8 + $0x30] sm:$0xff] }
  0x25   :  { %v216_v36 = vrot.slane %v215_v31, 2  ;;  %v229_v42 = vadd.f32 %v228_v25, %v227_v17  ;;  %v223_v47 = vrot.slane %v222_v32, 2  ;;  %v248_v48 = vadd.f32 %v650_v27, %v649_v26  ;;  %472 = vmatpush.bf16.msra.mxu1 %v585_v6  ;;  %v580_v6 = vld [vmem:[#allocation8 + $0x8] sm:$0xff] }
  0x26   :  { %v203_v43 = vadd.f32 %v202_v37, %v201_v28  ;;  %v210_v45 = vadd.f32 %v209_v38, %v208_v29  ;;  %v148_v49 = vrot.slane %v147_v18, 1  ;;  %v180_v50 = vadd.f32 %v179_v8, %v843_v51 }
  0x27   :  { %392 = vmatpush.bf16.msra.mxu0 %v572_v9  ;;  %v217_v52 = vadd.f32 %v216_v36, %v215_v31  ;;  %v242_v53 = vrot.slane %v241_v33, 4  ;;  %v155_v54 = vrot.slane %v154_v22, 1  ;;  %v236_v56 = vadd.f32 %v235_v35, %v234_v21 }
  0x28   :  { %v204_v44 = vrot.slane %v203_v43, 1  ;;  %v211_v55 = vrot.slane %v210_v45, 1  ;;  %v174_v57 = vrot.slane %v173_v41, 2  ;;  %v187_v58 = vadd.f32 %v186_v30, %v185_v63 }
  0x29   :  { %v193_v46 = vrot.slane %v845_v7, 4  ;;  %v230_v59 = vrot.slane %v229_v42, 2  ;;  %v162_v61 = vrot.slane %v161_v34, 1  ;;  %v168_v62 = vadd.f32 %v167_v40, %v166_v5  ;;  %473 = vmatpush.bf16.msra.mxu1 %v584_v20 }
  0x2a   :  { %v224_v0 = vadd.f32 %v223_v47, %v222_v32  ;;  %v249_v1 = vrot.slane %v248_v48, 4  ;;  %v149_v2 = vadd.f32 %v148_v49, %v147_v18  ;;  %v181_v3 = vrot.slane %v180_v50, 2 }
  0x2b   :  { %393 = vmatpush.bf16.msra.mxu0 %v571_v39  ;;  %v218_v4 = vrot.slane %v217_v52, 1  ;;  %v243_v51 = vadd.f32 %v242_v53, %v241_v33  ;;  %v156_v8 = vadd.f32 %v155_v54, %v154_v22  ;;  %v205_v9 = vadd.f32 %v204_v44, %v203_v43 }
  0x2c   :  { %v212_v10 = vadd.f32 %v211_v55, %v210_v45  ;;  %v237_v11 = vrot.slane %v236_v56, 2  ;;  %v175_v63 = vadd.f32 %v174_v57, %v173_v41  ;;  %v231_v12 = vadd.f32 %v230_v59, %v229_v42 }
  0x2d   :  { %v169_v13 = vrot.slane %v168_v62, 1  ;;  %v194_v14 = vadd.f32 %v193_v46, %v845_v7  ;;  %v225_v5 = vrot.slane %v224_v0, 1  ;;  %v250_v15 = vadd.f32 %v249_v1, %v248_v48 }
  0x2e   :  { %v163_v16 = vadd.f32 %v162_v61, %v161_v34  ;;  %v188_v17 = vrot.slane %v187_v58, 2  ;;  %v219_v18 = vadd.f32 %v218_v4, %v217_v52  ;;  %v244_v19 = vrot.slane %v243_v51, 2  ;;  %v582_v4 = vld [vmem:[#allocation8 + $0x18] sm:$0xff] }
  0x2f   :  { %v182_v21 = vadd.f32 %v181_v3, %v180_v50  ;;  %v272_v22 = vsel %vm271_vm0, %v156_v8, %v149_v2  ;;  %v238_v23 = vadd.f32 %v237_v11, %v236_v56  ;;  %v285_v24 = vsel %vm271_vm0, %v212_v10, %v205_v9  ;;  %v583_v3 = vld [vmem:[#allocation8 + $0x20] sm:$0xff] }
  0x30   :  { %v176_v25 = vrot.slane %v175_v63, 1  ;;  %v232_v26 = vrot.slane %v231_v12, 1  ;;  %v170_v27 = vadd.f32 %v169_v13, %v168_v62  ;;  %v195_v28 = vrot.slane %v194_v14, 2  ;;  %474 = vmatpush.bf16.msra.mxu1 %v583_v3  ;;  %v579_v8 = vld [vmem:[#allocation8] sm:$0xff] }
  0x31   :  { %v226_v7 = vadd.f32 %v225_v5, %v224_v0  ;;  %v251_v29 = vrot.slane %v250_v15, 2  ;;  %v189_v30 = vadd.f32 %v188_v17, %v187_v58  ;;  %v274_v31 = vsel %vm273_vm1, %v163_v16, %v272_v22  ;;  %v676_v10 = vld [vmem:[%s869_s3] ss:$0 sm:$0xff] }
  0x32   :  { %v245_v32 = vadd.f32 %v244_v19, %v243_v51  ;;  %v286_v33 = vsel %vm273_vm1, %v219_v18, %v285_v24  ;;  %v183_v34 = vrot.slane %v182_v21, 1  ;;  %v239_v37 = vrot.slane %v238_v23, 1  ;;  %v581_v51 = vld [vmem:[#allocation8 + $0x10] sm:$0xff] }
  0x33   :  { %v177_v38 = vadd.f32 %v176_v25, %v175_v63  ;;  %v233_v35 = vadd.f32 %v232_v26, %v231_v12  ;;  %v196_v39 = vadd.f32 %v195_v28, %v194_v14  ;;  %v276_v40 = vsel %vm275_vm2, %v170_v27, %v274_v31 }
  0x34   :  { %v252_v41 = vadd.f32 %v251_v29, %v250_v15  ;;  %v287_v36 = vsel %vm275_vm2, %v226_v7, %v286_v33  ;;  %v190_v42 = vrot.slane %v189_v30, 1  ;;  %v246_v43 = vrot.slane %v245_v32, 1  ;;  %475 = vmatpush.bf16.msra.mxu1 %v582_v4  ;;  %v677_v15 = vld [vmem:[%s871_s5] ss:$0 sm:$0xff] }
  0x35   :  { %v184_v45 = vadd.f32 %v183_v34, %v182_v21  ;;  %v240_v47 = vadd.f32 %v239_v37, %v238_v23  ;;  %v278_v48 = vsel %vm277_vm3, %v177_v38, %v276_v40  ;;  %v288_v49 = vsel %vm277_vm3, %v233_v35, %v287_v36 }
  0x36   :  { %v197_v50 = vrot.slane %v196_v39, 1  ;;  %v253_v52 = vrot.slane %v252_v41, 1  ;;  %v191_v53 = vadd.f32 %v190_v42, %v189_v30  ;;  %v247_v54 = vadd.f32 %v246_v43, %v245_v32 }
  0x37   :  { %v280_v55 = vsel %vm279_vm4, %v184_v45, %v278_v48  ;;  %v289_v56 = vsel %vm279_vm4, %v240_v47, %v288_v49 }
  0x38   :  { %v198_v57 = vadd.f32 %v197_v50, %v196_v39  ;;  %v254_v58 = vadd.f32 %v253_v52, %v252_v41  ;;  %v282_v46 = vsel %vm281_vm5, %v191_v53, %v280_v55  ;;  %v290_v59 = vsel %vm281_vm5, %v247_v54, %v289_v56  ;;  %476 = vmatpush.bf16.msra.mxu1 %v581_v51 }
  0x3a   :  { %v284_v60 = vsel %vm283_vm6, %v198_v57, %v282_v46  ;;  %v291_v61 = vsel %vm283_vm6, %v254_v58, %v290_v59 }
  0x3c   :  { %477 = vmatpush.bf16.msra.mxu1 %v580_v6 }
  0x40   :  { %478 = vmatpush.bf16.msra.mxu1 %v579_v8 }
  0x82   :  { %v308_v44 = vpop.permute.xlu0 %307 }
  0x83   :  { %v315_v0 = vmul.f32 %v308_v44, %v284_v60 }
  0x8a   :  { %v313_v62 = vpop.permute.xlu0 %312 }
  0x8b   :  { %v316_v1 = vmul.f32 %v313_v62, %v291_v61 }
  0x8d   :  { %v317_v2 = vpack.c.bf16 %v316_v1, %v315_v0 }
  0x8f   :  { %394 = vmatmul.bf16.vlgmr.msra.gmra.mxu0 %v317_v2 }
 0x10c   :  { %v395_v9 = vpop.f32.mrf.mxu0 }
 0x10d   :  { %v396_v11 = vadd.f32 %v676_v10, %v395_v9 }
 0x10f   :  { %678 = vtanh.f32 %v396_v11 }
 0x114   :  { %v397_v63 = vpop.f32.mrf.mxu0 }
 0x115   :  { %v398_v12 = vadd.f32 %v676_v10, %v397_v63  ;;  %v679_v13 = vpop.eup %678 }
 0x117   :  { %680 = vtanh.f32 %v398_v12 }
 0x11d   :  { %v681_v14 = vpop.eup %680 }
 0x11e   :  { %v402_v5 = vpack.c.bf16 %v681_v14, %v679_v13 }
 0x120   :  { %479 = vmatmul.bf16.vlgmr.msra.gmra.mxu1 %v402_v5 }
 0x19d   :  { %v480_v16 = vpop.f32.mrf.mxu1 }
 0x19e   :  { %v481_v17 = vadd.f32 %v677_v15, %v480_v16 }
 0x1a0   :  { %485 = vst [vmem:[#allocation9] sm:$0xff] %v481_v17 }
 0x1a5   :  { %v482_v18 = vpop.f32.mrf.mxu1 }
 0x1a6   :  { %v483_v19 = vadd.f32 %v677_v15, %v482_v18 }
 0x1a8   :  { %486 = vst [vmem:[#allocation9 + $0x8] sm:$0xff] %v483_v19 }
 0x1a9   :  { %499 = dma.vmem_to_hbm [thread:$0]  %s492_s19, 256, %s494_s21, [#allocation5], %s791_s22, %s791_s22, %s792_s23  }
 0x1aa   :  { %782 = dma.done.wait [#allocation5], 256  }
 0x1ab   :  { %783 = vsyncadd [#allocation5], 4294967040 }
 0x1ac   :  { %504 = vsyncpa [#allocation4], 1 }
 0x1ad   :  { %505 = vsyncpa [#allocation7], 1 }
 0x1ae   :  { %506 = vsyncpa [#allocation5], 1 }

</bundles_post_ra>
